<compile_context>
chip_gen: v7x
topology: tpu7x:2x2x1
jax: 0.10.0
libtpu: 0.0.40
codegen_flags: <defaults>
</compile_context>

<pallas_src>
import functools

import jax
import jax.numpy as jnp
from jax.experimental import pallas as pl
from jax.experimental.pallas import tpu as pltpu


def attention_kernel(x_ref, w1bd_ref, b1_ref, w2bd_ref, ctx_ref, attw_ref, *, T, D):
    # x_ref:    (TB, T*D) f32      lane-dense input tile
    # w1bd_ref: (T*D, T*H) bf16    block-diagonal layer-1 weight
    # b1_ref:   (1, T*H)   f32     layer-1 bias tiled T times
    # w2bd_ref: (T*H, T)   bf16    block-diagonal layer-2 weight
    # ctx_ref:  (TB, D)    f32     context output
    # attw_ref: (TB, T)    f32     attention weights output
    x = x_ref[...]                                       # (TB, T*D) f32

    # ---- Layer 1: one lane-dense MXU matmul (bf16 operands, f32 accum) ----
    h = jnp.dot(x.astype(jnp.bfloat16), w1bd_ref[...],
                preferred_element_type=jnp.float32)      # (TB, T*H)
    h = jnp.maximum(h + b1_ref[...], 0.0)

    # ---- Layer 2: block-diagonal matmul -> per-timestep scores (T in lanes) ----
    s = jnp.dot(h.astype(jnp.bfloat16), w2bd_ref[...],
                preferred_element_type=jnp.float32)      # (TB, T)
    # (b2 omitted: softmax is shift-invariant, outputs are unchanged.)

    # ---- Numerically stable softmax over T (lane axis), exact divide ----
    m = jnp.max(s, axis=-1, keepdims=True)               # (TB, 1)
    e = jnp.exp(s - m)                                    # (TB, T)
    w = e / jnp.sum(e, axis=-1, keepdims=True)            # (TB, T)
    attw_ref[...] = w

    # ---- context[b, d] = sum_t w[b, t] * x[b, t*D + d] ----
    # Unrolled accumulate over T keeps only a (TB, D) accumulator live.
    ctx = w[:, 0:1] * x[:, 0:D]
    for t in range(1, T):
        ctx = ctx + w[:, t:t + 1] * x[:, t * D:(t + 1) * D]
    ctx_ref[...] = ctx


def attention_forward(x, w1, b1, w2, b2, block_b=None):
    """x: (B, T, D) f32; w1: (D, H); b1: (H,); w2: (H, 1); b2: (1,).
    Returns (context (B, D), attention_weights (B, T))."""
    B, T, D = x.shape
    H = w1.shape[1]
    TD, TH = T * D, T * H

    # Lane-dense HBM view of x (row-major reshape: no data movement).
    x2 = x.reshape(B, TD)

    # Block-diagonal weights (tiny, built once per call) + T-tiled layer-1 bias.
    eye_t = jnp.eye(T, dtype=jnp.float32)
    w1bd = jnp.kron(eye_t, w1).astype(jnp.bfloat16)                 # (TD, TH)
    w2bd = jnp.kron(eye_t, w2.reshape(H, 1)).astype(jnp.bfloat16)   # (TH, T)
    b1bd = jnp.tile(b1.reshape(1, H), (1, T)).astype(jnp.float32)   # (1, TH)
    del b2  # softmax is invariant to the scalar output bias

    # Batch-block size: ~2 MiB f32 x tiles, multiple of 8 (sublane aligned);
    # cap at ceil(B/2) rounded to 8 when B >= 16 so the parallel axis spans
    # both v7x TensorCores. No padding copy: ragged edge block is masked.
    row_bytes = TD * 4
    if block_b is None:
        block_b = max(8, min(2048, (2 << 20) // max(row_bytes, 1)))
    if B >= 16:
        half = -(-B // 2)            # ceil(B/2)
        half = -(-half // 8) * 8     # round up to a multiple of 8
        block_b = min(block_b, half)
    block_b = max(8, block_b - block_b % 8)
    if block_b >= B:
        block_b = B                  # single full-size block (equals array dim)
    n_blocks = pl.cdiv(B, block_b)

    ctx, attw = pl.pallas_call(
        functools.partial(attention_kernel, T=T, D=D),
        out_shape=(
            jax.ShapeDtypeStruct((B, D), jnp.float32),
            jax.ShapeDtypeStruct((B, T), jnp.float32),
        ),
        grid_spec=pltpu.PrefetchScalarGridSpec(
            num_scalar_prefetch=0,
            grid=(n_blocks,),
            in_specs=[
                pl.BlockSpec((block_b, TD), lambda b: (b, 0)),   # x (lane-dense)
                pl.BlockSpec((TD, TH), lambda b: (0, 0)),        # W1 block-diag
                pl.BlockSpec((1, TH), lambda b: (0, 0)),         # b1 tiled
                pl.BlockSpec((TH, T), lambda b: (0, 0)),         # W2 block-diag
            ],
            out_specs=[
                pl.BlockSpec((block_b, D), lambda b: (b, 0)),    # context
                pl.BlockSpec((block_b, T), lambda b: (b, 0)),    # weights
            ],
        ),
        compiler_params=pltpu.CompilerParams(
            dimension_semantics=("parallel",),
            vmem_limit_bytes=32 * 1024 * 1024,
        ),
    )(x2, w1bd, b1bd, w2bd)
    return ctx, attw


_P_HIGH = jax.lax.Precision.HIGHEST


def _reference_f32(x, w1, b1, w2, b2):
    # Pure f32 reference mirroring the PyTorch forward (exact matmuls).
    h = jnp.maximum(jnp.einsum("btd,dh->bth", x, w1, precision=_P_HIGH) + b1, 0.0)
    s = jnp.einsum("bth,ho->bto", h, w2, precision=_P_HIGH)[..., 0] + b2[0]
    w = jax.nn.softmax(s, axis=1)
    ctx = jnp.einsum("bt,btd->bd", w, x, precision=_P_HIGH)
    return ctx, w


def _reference_bf16_matched(x, w1, b1, w2, b2):
    # Reference that mirrors the kernel's bf16-operand / f32-accumulation MXU
    # policy, for a tight apples-to-apples check.
    f32, bf16 = jnp.float32, jnp.bfloat16
    xb = x.astype(bf16).astype(f32)
    w1b = w1.astype(bf16).astype(f32)
    w2b = w2.astype(bf16).astype(f32)
    h = jnp.maximum(jnp.einsum("btd,dh->bth", xb, w1b, precision=_P_HIGH) + b1, 0.0)
    hb = h.astype(bf16).astype(f32)
    s = jnp.einsum("bth,ho->bto", hb, w2b, precision=_P_HIGH)[..., 0]
    w = jax.nn.softmax(s, axis=1)
    ctx = jnp.einsum("bt,btd->bd", w, x, precision=_P_HIGH)
    return ctx, w


def _make_params(key, D, H):
    # PyTorch nn.Linear default init: U(-1/sqrt(fan_in), 1/sqrt(fan_in)).
    k1, k2, k3, k4 = jax.random.split(key, 4)
    bound1 = 1.0 / (D ** 0.5)
    w1 = jax.random.uniform(k1, (D, H), jnp.float32, -bound1, bound1)
    b1 = jax.random.uniform(k2, (H,), jnp.float32, -bound1, bound1)
    bound2 = 1.0 / (H ** 0.5)
    w2 = jax.random.uniform(k3, (H, 1), jnp.float32, -bound2, bound2)
    b2 = jax.random.uniform(k4, (1,), jnp.float32, -bound2, bound2)
    return w1, b1, w2, b2


if __name__ == "__main__":
    key = jax.random.PRNGKey(0)
    T, D = 8, 32
    H = D // 2

    kx1, kx2, kp = jax.random.split(key, 3)
    w1, b1, w2, b2 = _make_params(kp, D, H)

    # Case 1: tiny batch, single block (grid = 1).
    B1 = 4
    x1 = jax.random.normal(kx1, (B1, T, D), dtype=jnp.float32)
    ctx1, attw1 = attention_forward(x1, w1, b1, w2, b2)
    jax.block_until_ready((ctx1, attw1))
    c_m, a_m = _reference_bf16_matched(x1, w1, b1, w2, b2)
    assert jnp.allclose(ctx1, c_m, atol=2e-3, rtol=2e-3)
    assert jnp.allclose(attw1, a_m, atol=2e-3, rtol=2e-3)
    c_f, a_f = _reference_f32(x1, w1, b1, w2, b2)
    assert jnp.allclose(ctx1, c_f, atol=2e-2, rtol=2e-2)
    assert jnp.allclose(attw1, a_f, atol=2e-2, rtol=2e-2)

    # Case 2: B=20 -> block_b=16, grid=2 (megacore-splittable), ragged last
    # block handled by Pallas edge masking (no jnp.pad copy of x).
    B2 = 20
    x2 = jax.random.normal(kx2, (B2, T, D), dtype=jnp.float32)
    ctx2, attw2 = attention_forward(x2, w1, b1, w2, b2)
    jax.block_until_ready((ctx2, attw2))
    c_m2, a_m2 = _reference_bf16_matched(x2, w1, b1, w2, b2)
    assert jnp.allclose(ctx2, c_m2, atol=2e-3, rtol=2e-3)
    assert jnp.allclose(attw2, a_m2, atol=2e-3, rtol=2e-3)
    c_f2, a_f2 = _reference_f32(x2, w1, b1, w2, b2)
    assert jnp.allclose(ctx2, c_f2, atol=2e-2, rtol=2e-2)
    assert jnp.allclose(attw2, a_f2, atol=2e-2, rtol=2e-2)
    # Attention weights sum to 1 per row (exact-divide softmax).
    assert jnp.allclose(jnp.sum(attw2, axis=1), 1.0, atol=1e-5)

    print("KERNEL_OK")
</pallas_src>

<mosaic_0001>
module attributes {stable_mosaic.version = 11 : i64} {
  func.func @attention_kernel(%arg0: i32, %arg1: memref<4x256xf32, #tpu.memory_space<vmem>>, %arg2: memref<256x128xbf16, #tpu.memory_space<vmem>>, %arg3: memref<1x128xf32, #tpu.memory_space<vmem>>, %arg4: memref<128x8xbf16, #tpu.memory_space<vmem>>, %arg5: memref<4x32xf32, #tpu.memory_space<vmem>>, %arg6: memref<4x8xf32, #tpu.memory_space<vmem>>) attributes {dimension_semantics = [#tpu.dimension_semantics<parallel>], iteration_bounds = array<i64: 1>, scalar_prefetch = 0 : i64, scratch_operands = 0 : i64, tpu.core_type = #tpu.core_type<tc>, window_params = [{transform_indices = @transform_0, window_bounds = array<i64: 4, 256>}, {pipeline_mode = #tpu.pipeline_mode<synchronous>, transform_indices = @transform_1, window_bounds = array<i64: 256, 128>}, {pipeline_mode = #tpu.pipeline_mode<synchronous>, transform_indices = @transform_2, window_bounds = array<i64: 1, 128>}, {pipeline_mode = #tpu.pipeline_mode<synchronous>, transform_indices = @transform_3, window_bounds = array<i64: 128, 8>}, {transform_indices = @transform_4, window_bounds = array<i64: 4, 32>}, {transform_indices = @transform_5, window_bounds = array<i64: 4, 8>}]} {
    %c0 = arith.constant 0 : index
    %c0_0 = arith.constant 0 : index
    %0 = vector.load %arg1[%c0, %c0_0] : memref<4x256xf32, #tpu.memory_space<vmem>>, vector<4x256xf32>
    %1 = arith.truncf %0 : vector<4x256xf32> to vector<4x256xbf16>
    %c0_1 = arith.constant 0 : index
    %c0_2 = arith.constant 0 : index
    %2 = vector.load %arg2[%c0_1, %c0_2] : memref<256x128xbf16, #tpu.memory_space<vmem>>, vector<256x128xbf16>
    %cst = arith.constant dense<0.000000e+00> : vector<4x128xf32>
    %3 = tpu.matmul %1, %2, %cst {dimension_numbers = #tpu.dot_dimension_numbers<[1], [0], [0], [1], [0, 0, 1, 1], [], []>} : vector<4x256xbf16>, vector<256x128xbf16>, vector<4x128xf32> -> vector<4x128xf32>
    %c0_3 = arith.constant 0 : index
    %c0_4 = arith.constant 0 : index
    %4 = vector.load %arg3[%c0_3, %c0_4] : memref<1x128xf32, #tpu.memory_space<vmem>>, vector<1x128xf32>
    %5 = vector.broadcast %4 : vector<1x128xf32> to vector<4x128xf32>
    %6 = arith.addf %3, %5 : vector<4x128xf32>
    %cst_5 = arith.constant 0.000000e+00 : f32
    %7 = vector.broadcast %cst_5 : f32 to vector<4x128xf32>
    %8 = arith.maximumf %6, %7 : vector<4x128xf32>
    %9 = arith.truncf %8 : vector<4x128xf32> to vector<4x128xbf16>
    %c0_6 = arith.constant 0 : index
    %c0_7 = arith.constant 0 : index
    %10 = vector.load %arg4[%c0_6, %c0_7] : memref<128x8xbf16, #tpu.memory_space<vmem>>, vector<128x8xbf16>
    %cst_8 = arith.constant dense<0.000000e+00> : vector<4x8xf32>
    %11 = tpu.matmul %9, %10, %cst_8 {dimension_numbers = #tpu.dot_dimension_numbers<[1], [0], [0], [1], [0, 0, 1, 1], [], []>} : vector<4x128xbf16>, vector<128x8xbf16>, vector<4x8xf32> -> vector<4x8xf32>
    %cst_9 = arith.constant dense<0xFF800000> : vector<4xf32>
    %12 = vector.multi_reduction <maximumf>, %11, %cst_9 [1] : vector<4x8xf32> to vector<4xf32>
    %13 = vector.shape_cast %12 : vector<4xf32> to vector<4x1xf32>
    %14 = vector.broadcast %13 : vector<4x1xf32> to vector<4x8xf32>
    %15 = arith.subf %11, %14 : vector<4x8xf32>
    %16 = math.exp %15 : vector<4x8xf32>
    %cst_10 = arith.constant dense<0.000000e+00> : vector<4xf32>
    %17 = vector.multi_reduction <add>, %16, %cst_10 [1] : vector<4x8xf32> to vector<4xf32>
    %18 = vector.shape_cast %17 : vector<4xf32> to vector<4x1xf32>
    %19 = vector.broadcast %18 : vector<4x1xf32> to vector<4x8xf32>
    %20 = arith.divf %16, %19 : vector<4x8xf32>
    %c0_11 = arith.constant 0 : index
    %c0_12 = arith.constant 0 : index
    %21 = vector.load %arg6[%c0_11, %c0_12] : memref<4x8xf32, #tpu.memory_space<vmem>>, vector<4x8xf32>
    tpu.vector_store %arg6[%c0_11, %c0_12], %20 {strides = array<i32>} : memref<4x8xf32, #tpu.memory_space<vmem>>, vector<4x8xf32>,
    %22 = vector.extract_strided_slice %20 {offsets = [0, 0], sizes = [4, 1], strides = [1, 1]} : vector<4x8xf32> to vector<4x1xf32>
    %23 = vector.extract_strided_slice %0 {offsets = [0, 0], sizes = [4, 32], strides = [1, 1]} : vector<4x256xf32> to vector<4x32xf32>
    %24 = vector.broadcast %22 : vector<4x1xf32> to vector<4x32xf32>
    %25 = arith.mulf %24, %23 : vector<4x32xf32>
    %26 = vector.extract_strided_slice %20 {offsets = [0, 1], sizes = [4, 1], strides = [1, 1]} : vector<4x8xf32> to vector<4x1xf32>
    %27 = vector.extract_strided_slice %0 {offsets = [0, 32], sizes = [4, 32], strides = [1, 1]} : vector<4x256xf32> to vector<4x32xf32>
    %28 = vector.broadcast %26 : vector<4x1xf32> to vector<4x32xf32>
    %29 = arith.mulf %28, %27 : vector<4x32xf32>
    %30 = arith.addf %25, %29 : vector<4x32xf32>
    %31 = vector.extract_strided_slice %20 {offsets = [0, 2], sizes = [4, 1], strides = [1, 1]} : vector<4x8xf32> to vector<4x1xf32>
    %32 = vector.extract_strided_slice %0 {offsets = [0, 64], sizes = [4, 32], strides = [1, 1]} : vector<4x256xf32> to vector<4x32xf32>
    %33 = vector.broadcast %31 : vector<4x1xf32> to vector<4x32xf32>
    %34 = arith.mulf %33, %32 : vector<4x32xf32>
    %35 = arith.addf %30, %34 : vector<4x32xf32>
    %36 = vector.extract_strided_slice %20 {offsets = [0, 3], sizes = [4, 1], strides = [1, 1]} : vector<4x8xf32> to vector<4x1xf32>
    %37 = vector.extract_strided_slice %0 {offsets = [0, 96], sizes = [4, 32], strides = [1, 1]} : vector<4x256xf32> to vector<4x32xf32>
    %38 = vector.broadcast %36 : vector<4x1xf32> to vector<4x32xf32>
    %39 = arith.mulf %38, %37 : vector<4x32xf32>
    %40 = arith.addf %35, %39 : vector<4x32xf32>
    %41 = vector.extract_strided_slice %20 {offsets = [0, 4], sizes = [4, 1], strides = [1, 1]} : vector<4x8xf32> to vector<4x1xf32>
    %42 = vector.extract_strided_slice %0 {offsets = [0, 128], sizes = [4, 32], strides = [1, 1]} : vector<4x256xf32> to vector<4x32xf32>
    %43 = vector.broadcast %41 : vector<4x1xf32> to vector<4x32xf32>
    %44 = arith.mulf %43, %42 : vector<4x32xf32>
    %45 = arith.addf %40, %44 : vector<4x32xf32>
    %46 = vector.extract_strided_slice %20 {offsets = [0, 5], sizes = [4, 1], strides = [1, 1]} : vector<4x8xf32> to vector<4x1xf32>
    %47 = vector.extract_strided_slice %0 {offsets = [0, 160], sizes = [4, 32], strides = [1, 1]} : vector<4x256xf32> to vector<4x32xf32>
    %48 = vector.broadcast %46 : vector<4x1xf32> to vector<4x32xf32>
    %49 = arith.mulf %48, %47 : vector<4x32xf32>
    %50 = arith.addf %45, %49 : vector<4x32xf32>
    %51 = vector.extract_strided_slice %20 {offsets = [0, 6], sizes = [4, 1], strides = [1, 1]} : vector<4x8xf32> to vector<4x1xf32>
    %52 = vector.extract_strided_slice %0 {offsets = [0, 192], sizes = [4, 32], strides = [1, 1]} : vector<4x256xf32> to vector<4x32xf32>
    %53 = vector.broadcast %51 : vector<4x1xf32> to vector<4x32xf32>
    %54 = arith.mulf %53, %52 : vector<4x32xf32>
    %55 = arith.addf %50, %54 : vector<4x32xf32>
    %56 = vector.extract_strided_slice %20 {offsets = [0, 7], sizes = [4, 1], strides = [1, 1]} : vector<4x8xf32> to vector<4x1xf32>
    %57 = vector.extract_strided_slice %0 {offsets = [0, 224], sizes = [4, 32], strides = [1, 1]} : vector<4x256xf32> to vector<4x32xf32>
    %58 = vector.broadcast %56 : vector<4x1xf32> to vector<4x32xf32>
    %59 = arith.mulf %58, %57 : vector<4x32xf32>
    %60 = arith.addf %55, %59 : vector<4x32xf32>
    %c0_13 = arith.constant 0 : index
    %c0_14 = arith.constant 0 : index
    %61 = vector.load %arg5[%c0_13, %c0_14] : memref<4x32xf32, #tpu.memory_space<vmem>>, vector<4x32xf32>
    tpu.vector_store %arg5[%c0_13, %c0_14], %60 {strides = array<i32>} : memref<4x32xf32, #tpu.memory_space<vmem>>, vector<4x32xf32>,
    return
  }
  func.func @transform_0(%arg0: i32) -> (i32, i32) {
    %c0_i32 = arith.constant 0 : i32
    %c0_i32_0 = arith.constant 0 : i32
    return %arg0, %c0_i32 : i32, i32
  }
  func.func @transform_1(%arg0: i32) -> (i32, i32) {
    %c0_i32 = arith.constant 0 : i32
    %c0_i32_0 = arith.constant 0 : i32
    %c0_i32_1 = arith.constant 0 : i32
    return %c0_i32, %c0_i32_0 : i32, i32
  }
  func.func @transform_2(%arg0: i32) -> (i32, i32) {
    %c0_i32 = arith.constant 0 : i32
    %c0_i32_0 = arith.constant 0 : i32
    %c0_i32_1 = arith.constant 0 : i32
    return %c0_i32, %c0_i32_0 : i32, i32
  }
  func.func @transform_3(%arg0: i32) -> (i32, i32) {
    %c0_i32 = arith.constant 0 : i32
    %c0_i32_0 = arith.constant 0 : i32
    %c0_i32_1 = arith.constant 0 : i32
    return %c0_i32, %c0_i32_0 : i32, i32
  }
  func.func @transform_4(%arg0: i32) -> (i32, i32) {
    %c0_i32 = arith.constant 0 : i32
    %c0_i32_0 = arith.constant 0 : i32
    return %arg0, %c0_i32 : i32, i32
  }
  func.func @transform_5(%arg0: i32) -> (i32, i32) {
    %c0_i32 = arith.constant 0 : i32
    %c0_i32_0 = arith.constant 0 : i32
    return %arg0, %c0_i32 : i32, i32
  }
}

</mosaic_0001>

<bundles_post_ra>
// kernel: tpu_custom_call.1
= control target key start
LH: loop header
LB: loop body
LE: loop exit
PB: predicated region body
PF: predicated region fallthrough
CT: control target
= control target key end

     0   :  { %11 = vsyncpa [#allocation3], 0  ;;  %s783_s0 = inlined_call_operand.vmem [shape: f32[4,256], index: 0, kind: input, shape index: {}]   ;;  %s784_s1 = inlined_call_operand.hbm [shape: bf16[256,128], index: 1, kind: input, shape index: {}]   ;;  %s785_s2 = inlined_call_operand.vmem [shape: f32[1,128], index: 2, kind: input, shape index: {}]   ;;  %s786_s3 = inlined_call_operand.vmem [shape: bf16[128,8], index: 3, kind: input, shape index: {}]   ;;  %s787_s4 = inlined_call_operand.hbm [shape: f32[4,32], index: 4, kind: output, shape index: {0}]   ;;  %s788_s5 = inlined_call_operand.hbm [shape: f32[4,8], index: 5, kind: output, shape index: {1}]  }
   0x1   :  { %12 = vsyncpa [#allocation4], 0 }
   0x2   :  { %13 = vsyncpa [#allocation7], 0  ;;  %s636_s18 = smov [#allocation2]   ;;  %s564_s22 = scalar_lea.hbm %s784_s1, 2048 }
   0x3   :  { %s21_s19 = sshll.u32 %s636_s18, 4  ;;  %p565_p0 = scmp.ne.s32.totalorder %s784_s1, %s564_s22  ;;  %s22_s19 = int_to_ptr.vmem [resolvable:$true] %s21_s19 }
   0x4   :  { %p568_p1 = scmp.lt.u32.totalorder %s564_s22, %s784_s1 }
   0x6   :  { %p570_p2 = pnand %p568_p1, %p565_p0 }
   0x8   :  { %573 = shalt.err (!%p570_p2)
}
   0x9   :  { %s574_s27 = scalar_lea.vmem %s22_s19, 2048  ;;  %p579_p4 = scmp.lt.s32.totalorder %s22_s19, %s22_s19 }
   0xa   :  { %p575_p3 = scmp.ne.s32.totalorder %s22_s19, %s574_s27  ;;  %p580_p5 = scmp.lt.s32.totalorder %s574_s27, %s574_s27 }
   0xc   :  { %p581_p6 = por %p580_p5, %p579_p4 }
   0xe   :  { %p582_p7 = pnand %p581_p6, %p575_p3 }
  0x10   :  { %585 = shalt.err (!%p582_p7)
}
  0x11   :  { %s637_s28 = smov 64   ;;  %s638_s29 = smov 4  }
  0x12   :  { %27 = dma.hbm_to_vmem [thread:$0]  %s784_s1, 2048, %s22_s19, [#allocation3], %s637_s28, %s637_s28, %s638_s29  }
  0x13   :  { %630 = dma.done.wait [#allocation3], 2048  }
  0x14   :  { %631 = vsyncadd [#allocation3], 4294965248  ;;  %v639_v0 = vmov 0.0   ;;  %v535_v1 = vld [vmem:[#allocation2 + $0x40] sm:$0xff]   ;;  %v537_v3 = vld [vmem:[#allocation2 + $0x48] sm:$0xff]   ;;  %vm640_vm0 = vmmov 0  }
  0x15   :  { %489 = vmatprep.subr.bf16.mxu1 %v639_v0  ;;  %v536_v2 = vld [vmem:[#allocation2] sm:$0xff]   ;;  %458 = vmatprep.subr.bf16.mxu0 %v535_v1  ;;  %v538_v4 = vld [vmem:[#allocation2 + $0x8] sm:$0xff]   ;;  %v539_v5 = vld [vmem:[#allocation2 + $0x50] sm:$0xff]   ;;  %vm323_vm1 = vcmask 60416   ;;  %v641_v48 = vmov 2   ;;  %v642_v49 = vmov 0  }
  0x16   :  { %459 = vmatpush3.bf16.msra.mxu0 %v536_v2  ;;  %v540_v6 = vld [vmem:[#allocation2 + $0x10] sm:$0xff]   ;;  %v541_v7 = vld [vmem:[#allocation2 + $0x58] sm:$0xff]   ;;  %v543_v9 = vld [vmem:[#allocation2 + $0x60] sm:$0xff]   ;;  %505 = vmatprep.mubr.msk.bf16.mxu1 %vm640_vm0, %v639_v0  ;;  %v643_v53 = vmov 1   ;;  %v644_v54 = vmov 7   ;;  %v646_v55 = vmov 3  }
  0x17   :  { %460 = vmatprep.subr.bf16.mxu0 %v537_v3  ;;  %v542_v8 = vld [vmem:[#allocation2 + $0x18] sm:$0xff]   ;;  %v544_v10 = vld [vmem:[#allocation2 + $0x20] sm:$0xff]   ;;  %v545_v11 = vld [vmem:[#allocation2 + $0x68] sm:$0xff]   ;;  %528 = vset.pattern.permute.xlu0 %v641_v48  ;;  %v648_v56 = vmov 4   ;;  %v649_v57 = vmov 5   ;;  %v650_v58 = vmov 6  }
  0x18   :  { %v701_v12 = vld [vmem:[%s783_s0] sm:$0xff]  ;;  %v546_v15 = vld [vmem:[#allocation2 + $0x28] sm:$0xff]   ;;  %v547_v18 = vld [vmem:[#allocation2 + $0x70] sm:$0xff]   ;;  %526 = vset.pattern.permute.xlu1 %v642_v49  ;;  %s651_s25 = smov [#allocation6]  }
  0x19   :  { %v705_v13 = vcombine.high %v701_v12, %v701_v12  ;;  %v552_v14 = vld [vmem:[%s786_s3] sm:$0xff]   ;;  %v553_v17 = vld [vmem:[%s786_s3 + $0x8] sm:$0xff]   ;;  %v548_v19 = vld [vmem:[#allocation2 + $0x30] sm:$0xff]   ;;  %v40_v24 = vpack.c.bf16 %v701_v12, %v701_v12  ;;  %s420_s26 = sshll.u32 %s651_s25, 4  ;;  %s421_s26 = int_to_ptr.vmem [resolvable:$true] %s420_s26 }
  0x1a   :  { %461 = vmatpush3.bf16.msra.mxu0 %v538_v4  ;;  %490 = vmatpush3.bf16.msra.mxu1 %v552_v14  ;;  %v554_v20 = vld [vmem:[%s786_s3 + $0x10] sm:$0xff]   ;;  %v549_v21 = vld [vmem:[#allocation2 + $0x78] sm:$0xff]   ;;  %v556_v25 = vld [vmem:[%s786_s3 + $0x20] sm:$0xff]   ;;  %s586_s27 = scalar_lea.vmem %s421_s26, 64  ;;  %p591_p9 = scmp.lt.s32.totalorder %s421_s26, %s421_s26 }
  0x1b   :  { %462 = vmatprep.subr.bf16.mxu0 %v539_v5  ;;  %v41_v16 = vpack.c.bf16 %v705_v13, %v705_v13  ;;  %491 = vmatprep.subr.bf16.mxu1 %v639_v0  ;;  %v550_v22 = vld [vmem:[#allocation2 + $0x38] sm:$0xff]   ;;  %v557_v26 = vld [vmem:[%s786_s3 + $0x28] sm:$0xff]   ;;  %v558_v27 = vld [vmem:[%s786_s3 + $0x30] sm:$0xff]   ;;  %p587_p8 = scmp.ne.s32.totalorder %s421_s26, %s586_s27  ;;  %p592_p10 = scmp.lt.s32.totalorder %s586_s27, %s586_s27 }
  0x1c   :  { %v555_v23 = vld [vmem:[%s786_s3 + $0x18] sm:$0xff]   ;;  %v433_v30 = vld [vmem:[%s785_s2] ss:$0 sm:$0xff]  ;;  %s645_s2 = smov 96  }
  0x1d   :  { %209 = vmatprep.mubr.bf16.mxu0 %v41_v16  ;;  %v559_v28 = vld [vmem:[%s786_s3 + $0x38] sm:$0xff]   ;;  %s647_s3 = smov 32   ;;  %p593_p11 = por %p592_p10, %p591_p9 }
  0x1e   :  { %463 = vmatpush3.bf16.msra.mxu0 %v540_v6  ;;  %492 = vmatpush3.bf16.msra.mxu1 %v553_v17 }
  0x1f   :  { %464 = vmatprep.subr.bf16.mxu0 %v541_v7  ;;  %493 = vmatprep.subr.bf16.mxu1 %v639_v0  ;;  %p594_p12 = pnand %p593_p11, %p587_p8 }
  0x22   :  { %465 = vmatpush3.bf16.msra.mxu0 %v542_v8  ;;  %494 = vmatpush3.bf16.msra.mxu1 %v554_v20 }
  0x23   :  { %466 = vmatprep.subr.bf16.mxu0 %v543_v9  ;;  %495 = vmatprep.subr.bf16.mxu1 %v639_v0 }
  0x26   :  { %467 = vmatpush3.bf16.msra.mxu0 %v544_v10  ;;  %496 = vmatpush3.bf16.msra.mxu1 %v555_v23 }
  0x27   :  { %468 = vmatprep.subr.bf16.mxu0 %v545_v11  ;;  %497 = vmatprep.subr.bf16.mxu1 %v639_v0 }
  0x2a   :  { %469 = vmatpush3.bf16.msra.mxu0 %v546_v15  ;;  %498 = vmatpush3.bf16.msra.mxu1 %v556_v25 }
  0x2b   :  { %470 = vmatprep.subr.bf16.mxu0 %v547_v18  ;;  %499 = vmatprep.subr.bf16.mxu1 %v639_v0 }
  0x2e   :  { %471 = vmatpush3.bf16.msra.mxu0 %v548_v19  ;;  %500 = vmatpush3.bf16.msra.mxu1 %v557_v26 }
  0x2f   :  { %472 = vmatprep.subr.bf16.mxu0 %v549_v21  ;;  %501 = vmatprep.subr.bf16.mxu1 %v639_v0 }
  0x32   :  { %473 = vmatpush3.bf16.msra.mxu0 %v550_v22  ;;  %502 = vmatpush3.bf16.msra.mxu1 %v558_v27 }
  0x33   :  { %503 = vmatprep.subr.bf16.mxu1 %v639_v0 }
  0x35   :  { %210 = vmatmul.mubr.bf16.vlgmr.msra.gmra.mrb[0].mxu0 %v40_v24 }
  0x36   :  { %504 = vmatpush3.bf16.msra.mxu1 %v559_v28 }
 0x108   :  { %v474_v29 = vpop.f32.mrb[0].mxu0 }
 0x109   :  { %v475_v31 = vpop.f32.mrb[1].mxu0 }
 0x10a   :  { %v476_v32 = vadd.f32 %v475_v31, %v474_v29  ;;  %v477_v33 = vpop.f32.mrb[2].mxu0 }
 0x10b   :  { %v478_v34 = vpop.f32.mrb[3].mxu0 }
 0x10c   :  { %v212_v35 = vadd.f32 %v476_v32, %v433_v30 }
 0x10e   :  { %v217_v36 = vmax.f32 %v212_v35, 0.0 }
 0x110   :  { %v218_v37 = vpack.c.bf16 %v217_v36, %v217_v36 }
 0x112   :  { %506 = vmatmul.mubr.bf16.vlgmr.msra.gmra.mrb[0].mxu1 %v218_v37 }
 0x1e5   :  { %v317_v38 = vpop.f32.mrb[0].mxu1 }
 0x1e6   :  { %v507_v39 = vpop.f32.mrb[1].mxu1  ;;  %v324_v40 = vsel %vm323_vm1, %v317_v38, -inf }
 0x1e7   :  { %325 = vmax.xlane.f32.xlu0 %v324_v40  ;;  %v320_v41 = vpop.f32.mrb[2].mxu1 }
 0x1e8   :  { %v508_v42 = vpop.f32.mrb[3].mxu1 }
 0x274   :  { %v326_v43 = vpop.xlane.xlu0 %325 }
 0x275   :  { %v327_v44 = vsub.f32 %v317_v38, %v326_v43 }
 0x277   :  { %v328_v45 = vmul.f32 1.442695, %v327_v44 }
 0x279   :  { %560 = vpow2.f32 %v328_v45 }
 0x283   :  { %v561_v46 = vpop.eup %560 }
 0x284   :  { %v330_v47 = vsel %vm323_vm1, %v561_v46, 0.0 }
 0x285   :  { %331 = vadd.xlane.f32.xlu0 %v330_v47 }
 0x312   :  { %v332_v50 = vpop.xlane.xlu0 %331 }
 0x313   :  { %562 = vrcp.f32 %v332_v50 }
 0x31d   :  { %v563_v51 = vpop.eup %562 }
 0x31e   :  { %v334_v52 = vmul.f32 %v563_v51, %v561_v46 }
 0x320   :  { %335 = vst.msk [vmem:[#allocation6] sm:$0xf] %vm323_vm1, %v334_v52  ;;  %352 = vperm.xlu0 %528, %v334_v52   ;;  %338 = vperm.xlu1 %526, %v334_v52  }
 0x324   :  { %527 = vset.pattern.permute.xlu1 %v643_v53  ;;  %534 = vset.pattern.permute.xlu0 %v644_v54 }
 0x325   :  { %343 = vperm.xlu1 %527, %v334_v52  }
 0x329   :  { %346 = vrot.lane.b32.xlu1 %v701_v12, %s645_s2 }
 0x32a   :  { %529 = vset.pattern.permute.xlu1 %v646_v55 }
 0x32d   :  { %355 = vrot.lane.b32.xlu1 %v701_v12, %s637_s28 }
 0x331   :  { %364 = vrot.lane.b32.xlu1 %v701_v12, %s647_s3 }
 0x335   :  { %379 = vrot.lane.b32.xlu1 %v705_v13, %s645_s2 }
 0x339   :  { %361 = vperm.xlu1 %529, %v334_v52  }
 0x33d   :  { %530 = vset.pattern.permute.xlu1 %v648_v56 }
 0x33e   :  { %370 = vperm.xlu1 %530, %v334_v52  }
 0x342   :  { %531 = vset.pattern.permute.xlu1 %v649_v57 }
 0x343   :  { %376 = vperm.xlu1 %531, %v334_v52  }
 0x347   :  { %532 = vset.pattern.permute.xlu1 %v650_v58 }
 0x348   :  { %385 = vperm.xlu1 %532, %v334_v52  }
 0x34c   :  { %533 = vset.pattern.permute.xlu1 %v644_v54 }
 0x34d   :  { %394 = vperm.xlu1 %533, %v334_v52  }
 0x351   :  { %388 = vrot.lane.b32.xlu1 %v705_v13, %s637_s28 }
 0x355   :  { %397 = vrot.lane.b32.xlu1 %v705_v13, %s647_s3 }
 0x356   :  { %597 = shalt.err (!%p594_p12)
}
 0x357   :  { %s598_s6 = scalar_lea.hbm %s788_s5, 64 }
 0x358   :  { %p599_p13 = scmp.ne.s32.totalorder %s788_s5, %s598_s6  ;;  %p602_p0 = scmp.lt.u32.totalorder %s598_s6, %s788_s5 }
 0x35a   :  { %p604_p1 = pnand %p602_p0, %p599_p13 }
 0x35c   :  { %607 = shalt.err (!%p604_p1)
}
 0x35d   :  { %423 = dma.vmem_to_hbm [thread:$0]  %s421_s26, 64, %s788_s5, [#allocation7]   ;;  %vm402_vm2 = vcmask 257024  }
 0x35e   :  { %s652_s5 = smov [#allocation5]  }
 0x35f   :  { %s410_s11 = sshll.u32 %s652_s5, 4  ;;  %s411_s11 = int_to_ptr.vmem [resolvable:$true] %s410_s11 }
 0x360   :  { %s608_s0 = scalar_lea.vmem %s411_s11, 64  ;;  %p613_p3 = scmp.lt.s32.totalorder %s411_s11, %s411_s11 }
 0x361   :  { %p609_p2 = scmp.ne.s32.totalorder %s411_s11, %s608_s0  ;;  %p614_p4 = scmp.lt.s32.totalorder %s608_s0, %s608_s0 }
 0x363   :  { %p615_p5 = por %p614_p4, %p613_p3 }
 0x365   :  { %p616_p6 = pnand %p615_p5, %p609_p2 }
 0x39f   :  { %v339_v59 = vpop.permute.xlu1 %338  ;;  %v353_v6 = vpop.permute.xlu0 %352 }
 0x3a0   :  { %v341_v7 = vmul.f32 %v339_v59, %v701_v12 }
 0x3a4   :  { %v344_v60 = vpop.permute.xlu1 %343 }
 0x3a8   :  { %v347_v61 = vpop.permute.xlu1 %346 }
 0x3a9   :  { %v349_v4 = vmul.f32 %v347_v61, %v344_v60 }
 0x3ab   :  { %v350_v9 = vadd.f32 %v349_v4, %v341_v7 }
 0x3ac   :  { %v356_v62 = vpop.permute.xlu1 %355 }
 0x3ad   :  { %v358_v8 = vmul.f32 %v356_v62, %v353_v6 }
 0x3af   :  { %v359_v14 = vadd.f32 %v358_v8, %v350_v9 }
 0x3b0   :  { %v365_v63 = vpop.permute.xlu1 %364 }
 0x3b4   :  { %v380_v0 = vpop.permute.xlu1 %379 }
 0x3b8   :  { %v362_v1 = vpop.permute.xlu1 %361 }
 0x3b9   :  { %v367_v10 = vmul.f32 %v365_v63, %v362_v1 }
 0x3bb   :  { %v368_v16 = vadd.f32 %v367_v10, %v359_v14 }
 0x3bd   :  { %v371_v2 = vpop.permute.xlu1 %370 }
 0x3be   :  { %v373_v15 = vmul.f32 %v371_v2, %v705_v13 }
 0x3c0   :  { %v374_v19 = vadd.f32 %v373_v15, %v368_v16 }
 0x3c2   :  { %v377_v3 = vpop.permute.xlu1 %376 }
 0x3c3   :  { %v382_v17 = vmul.f32 %v380_v0, %v377_v3 }
 0x3c5   :  { %v383_v21 = vadd.f32 %v382_v17, %v374_v19 }
 0x3c7   :  { %v386_v5 = vpop.permute.xlu1 %385 }
 0x3cc   :  { %v395_v11 = vpop.permute.xlu1 %394 }
 0x3d0   :  { %v389_v18 = vpop.permute.xlu1 %388 }
 0x3d1   :  { %v391_v20 = vmul.f32 %v389_v18, %v386_v5 }
 0x3d3   :  { %v392_v23 = vadd.f32 %v391_v20, %v383_v21 }
 0x3d4   :  { %v398_v22 = vpop.permute.xlu1 %397 }
 0x3d5   :  { %v400_v24 = vmul.f32 %v398_v22, %v395_v11 }
 0x3d7   :  { %v401_v12 = vadd.f32 %v400_v24, %v392_v23 }
 0x3d9   :  { %403 = vst.msk [vmem:[#allocation5] sm:$0xf] %vm402_vm2, %v401_v12 }
 0x3da   :  { %619 = shalt.err (!%p616_p6)
}
 0x3db   :  { %s620_s14 = scalar_lea.hbm %s787_s4, 64 }
 0x3dc   :  { %p621_p7 = scmp.ne.s32.totalorder %s787_s4, %s620_s14  ;;  %p624_p8 = scmp.lt.u32.totalorder %s620_s14, %s787_s4 }
 0x3de   :  { %p626_p9 = pnand %p624_p8, %p621_p7 }
 0x3e0   :  { %629 = shalt.err (!%p626_p9)
}
 0x3e1   :  { %413 = dma.vmem_to_hbm [thread:$0]  %s411_s11, 64, %s787_s4, [#allocation4]  }
 0x3e2   :  { %632 = dma.done.wait [#allocation4], 64  }
 0x3e3   :  { %633 = vsyncadd [#allocation4], 4294967232 }
 0x3e4   :  { %634 = dma.done.wait [#allocation7], 64  }
 0x3e5   :  { %635 = vsyncadd [#allocation7], 4294967232 }
 0x3e6   :  { %430 = vsyncpa [#allocation3], 1 }
 0x3e7   :  { %431 = vsyncpa [#allocation4], 1 }
 0x3e8   :  { %432 = vsyncpa [#allocation7], 1 }

</bundles_post_ra>
